<compile_context>
chip_gen: v7x
topology: tpu7x:2x2x1
jax: 0.10.0
libtpu: 0.0.40
codegen_flags: <defaults>
</compile_context>

<pallas_src>
import math
from functools import partial

import jax
import jax.numpy as jnp
from jax.experimental import pallas as pl
from jax.experimental.pallas import tpu as pltpu


def _encoder_layer_kernel(x_ref, wqkv_ref, bqkv_ref, wo_ref, bo_ref,
                          w1_ref, b1_ref, w2_ref, b2_ref, out_ref,
                          *, nhead):
    L, B, D = x_ref.shape
    hd = D // nhead
    G = B * nhead

    # (L, B, D) -> (L*B, D): contiguous reshape; rows ordered (l, b). Row order is
    # irrelevant for the GEMMs / residuals; only the attention grouping cares.
    x = x_ref[...].reshape(L * B, D)

    # ---- fused in-projection: ONE 2D GEMM (softmax scale folded into q columns) ----
    qkv = jnp.dot(x, wqkv_ref[...], preferred_element_type=jnp.float32) + bqkv_ref[...]

    # ---- head/batch grouping: (L*B, D) -> (B*H, L, hd) (tiny VMEM relayout) ----
    def to_groups(t):
        t4 = t.reshape(L, B, nhead, hd)
        return jnp.transpose(t4, (1, 2, 0, 3)).reshape(G, L, hd)

    q_g = to_groups(qkv[:, 0 * D:1 * D])
    k_g = to_groups(qkv[:, 1 * D:2 * D])
    v_g = to_groups(qkv[:, 2 * D:3 * D])

    # ---- scaled dot-product attention, batched over all (batch, head) groups ----
    # TODO(synk): at production seq lengths, build K directly in (G, hd, L) layout so
    # the QK^T contraction hits the MXU without per-group XLU transposes.
    s = jnp.einsum('gld,gmd->glm', q_g, k_g, preferred_element_type=jnp.float32)
    m = jnp.max(s, axis=-1, keepdims=True)
    e = jnp.exp(s - m)
    # Exact reciprocal keeps the 1e-4 check tight; approx=True would move it to EUP.
    p = e * pl.reciprocal(jnp.sum(e, axis=-1, keepdims=True), approx=False)
    o_g = jnp.einsum('glm,gmd->gld', p, v_g, preferred_element_type=jnp.float32)

    # ---- head merge + fused output projection: single (D, D) GEMM ----
    o4 = o_g.reshape(B, nhead, L, hd)
    o = jnp.transpose(o4, (2, 0, 1, 3)).reshape(L * B, D)   # rows (l,b), cols (h,d)
    attn = jnp.dot(o, wo_ref[...], preferred_element_type=jnp.float32) + bo_ref[...]

    src1 = x + attn                                          # residual 1 (dropout1 p=0)

    # ---- feed-forward: LeakyReLU(True) => negative_slope=1.0 => identity, omitted ----
    h1 = jnp.dot(src1, w1_ref[...], preferred_element_type=jnp.float32) + b1_ref[...]
    ffn = jnp.dot(h1, w2_ref[...], preferred_element_type=jnp.float32) + b2_ref[...]

    out_ref[...] = (src1 + ffn).reshape(L, B, D)             # residual 2 (dropout2 p=0)


def _prepare_params(params, nhead):
    """One-time rearrangement of PyTorch-layout weights into x @ W layouts."""
    in_w, in_b, out_w, out_b, w1, b1, w2, b2 = params
    d = out_w.shape[0]
    ff = w1.shape[0]
    hd = d // nhead
    scale = 1.0 / math.sqrt(hd)

    w_qkv = in_w.T                                           # (D, 3D)
    b_qkv = in_b.reshape(1, 3 * d)
    w_qkv = w_qkv.at[:, :d].multiply(scale)                  # fold 1/sqrt(hd) into q
    b_qkv = b_qkv.at[:, :d].multiply(scale)

    return (w_qkv, b_qkv,
            out_w.T, out_b.reshape(1, d),                    # (D, D),  (1, D)
            w1.T, b1.reshape(1, ff),                         # (D, FF), (1, FF)
            w2.T, b2.reshape(1, d))                          # (FF, D), (1, D)


def _full_spec(shape):
    zeros = (0,) * len(shape)
    return pl.BlockSpec(shape, lambda i, _z=zeros: _z)


def _forward(src, prepared, *, nhead):
    L, B, D = src.shape
    operands = (src,) + tuple(prepared)
    return pl.pallas_call(
        partial(_encoder_layer_kernel, nhead=nhead),
        grid=(1,),
        in_specs=[_full_spec(op.shape) for op in operands],
        out_specs=_full_spec((L, B, D)),
        out_shape=jax.ShapeDtypeStruct((L, B, D), jnp.float32),
        input_output_aliases={0: 0},
        compiler_params=pltpu.CompilerParams(dimension_semantics=("arbitrary",)),
    )(*operands)


def make_encoder_layer(params, nhead):
    """Prepare weights ONCE (transposes / scale fold are not in the per-call path)."""
    prepared = tuple(jnp.asarray(p) for p in _prepare_params(params, nhead))
    return jax.jit(lambda src: _forward(src, prepared, nhead=nhead))


def _reference(src, params, nhead):
    """Pure-JAX reference mirroring PyTorch semantics, for a sanity check."""
    in_w, in_b, out_w, out_b, w1, b1, w2, b2 = params
    L, B, D = src.shape
    hd = D // nhead
    qkv = src @ in_w.T + in_b                                # (L, B, 3D)
    q, k, v = qkv[..., :D], qkv[..., D:2 * D], qkv[..., 2 * D:]

    def split(t):                                            # (L, B, D) -> (B, H, L, hd)
        return jnp.transpose(t.reshape(L, B, nhead, hd), (1, 2, 0, 3))

    qh, kh, vh = split(q), split(k), split(v)
    s = jnp.einsum("bhld,bhmd->bhlm", qh, kh) / math.sqrt(hd)
    p = jax.nn.softmax(s, axis=-1)
    o = jnp.einsum("bhlm,bhmd->bhld", p, vh)
    o = jnp.transpose(o, (2, 0, 1, 3)).reshape(L, B, D)
    attn = o @ out_w.T + out_b
    src1 = src + attn
    h1 = src1 @ w1.T + b1                                    # LeakyReLU(True) -> identity
    return src1 + (h1 @ w2.T + b2)


if __name__ == "__main__":
    L, B, D, H, FF = 8, 2, 32, 4, 16                         # seq, batch, d_model, nhead, dim_feedforward

    key = jax.random.PRNGKey(0)
    ks = jax.random.split(key, 9)
    src = jax.random.normal(ks[0], (L, B, D), jnp.float32)

    # deterministic synthetic parameters (PyTorch nn.MultiheadAttention / nn.Linear shapes)
    in_w  = jax.random.normal(ks[1], (3 * D, D), jnp.float32) * 0.1
    in_b  = jax.random.normal(ks[2], (3 * D,), jnp.float32) * 0.1
    out_w = jax.random.normal(ks[3], (D, D), jnp.float32) * 0.1
    out_b = jax.random.normal(ks[4], (D,), jnp.float32) * 0.1
    w1    = jax.random.normal(ks[5], (FF, D), jnp.float32) * 0.1
    b1    = jax.random.normal(ks[6], (FF,), jnp.float32) * 0.1
    w2    = jax.random.normal(ks[7], (D, FF), jnp.float32) * 0.1
    b2    = jax.random.normal(ks[8], (D,), jnp.float32) * 0.1
    params = (in_w, in_b, out_w, out_b, w1, b1, w2, b2)

    ref = _reference(src, params, H)                         # computed before kernel call

    layer = make_encoder_layer(params, nhead=H)              # weight prep happens once here
    out = jax.block_until_ready(layer(src))

    assert out.shape == (L, B, D)
    assert jnp.allclose(out, ref, atol=1e-4, rtol=1e-4), "mismatch vs reference"
    print("KERNEL_OK")
</pallas_src>

<mosaic_0001>
module attributes {stable_mosaic.version = 11 : i64} {
  func.func @_encoder_layer_kernel(%arg0: i32, %arg1: memref<8x2x32xf32, #tpu.memory_space<vmem>>, %arg2: memref<32x96xf32, #tpu.memory_space<vmem>>, %arg3: memref<1x96xf32, #tpu.memory_space<vmem>>, %arg4: memref<32x32xf32, #tpu.memory_space<vmem>>, %arg5: memref<1x32xf32, #tpu.memory_space<vmem>>, %arg6: memref<32x16xf32, #tpu.memory_space<vmem>>, %arg7: memref<1x16xf32, #tpu.memory_space<vmem>>, %arg8: memref<16x32xf32, #tpu.memory_space<vmem>>, %arg9: memref<1x32xf32, #tpu.memory_space<vmem>>, %arg10: memref<8x2x32xf32, #tpu.memory_space<vmem>>) attributes {dimension_semantics = [#tpu.dimension_semantics<arbitrary>], iteration_bounds = array<i64: 1>, scalar_prefetch = 0 : i64, scratch_operands = 0 : i64, tpu.core_type = #tpu.core_type<tc>, window_params = [{pipeline_mode = #tpu.pipeline_mode<synchronous>, transform_indices = @transform_0, window_bounds = array<i64: 8, 2, 32>}, {pipeline_mode = #tpu.pipeline_mode<synchronous>, transform_indices = @transform_1, window_bounds = array<i64: 32, 96>}, {pipeline_mode = #tpu.pipeline_mode<synchronous>, transform_indices = @transform_2, window_bounds = array<i64: 1, 96>}, {pipeline_mode = #tpu.pipeline_mode<synchronous>, transform_indices = @transform_3, window_bounds = array<i64: 32, 32>}, {pipeline_mode = #tpu.pipeline_mode<synchronous>, transform_indices = @transform_4, window_bounds = array<i64: 1, 32>}, {pipeline_mode = #tpu.pipeline_mode<synchronous>, transform_indices = @transform_5, window_bounds = array<i64: 32, 16>}, {pipeline_mode = #tpu.pipeline_mode<synchronous>, transform_indices = @transform_6, window_bounds = array<i64: 1, 16>}, {pipeline_mode = #tpu.pipeline_mode<synchronous>, transform_indices = @transform_7, window_bounds = array<i64: 16, 32>}, {pipeline_mode = #tpu.pipeline_mode<synchronous>, transform_indices = @transform_8, window_bounds = array<i64: 1, 32>}, {pipeline_mode = #tpu.pipeline_mode<synchronous>, transform_indices = @transform_9, window_bounds = array<i64: 8, 2, 32>}]} {
    %c0 = arith.constant 0 : index
    %c0_0 = arith.constant 0 : index
    %c0_1 = arith.constant 0 : index
    %0 = vector.load %arg1[%c0, %c0_0, %c0_1] : memref<8x2x32xf32, #tpu.memory_space<vmem>>, vector<8x2x32xf32>
    %1 = vector.shape_cast %0 : vector<8x2x32xf32> to vector<16x32xf32>
    %c0_2 = arith.constant 0 : index
    %c0_3 = arith.constant 0 : index
    %2 = vector.load %arg2[%c0_2, %c0_3] : memref<32x96xf32, #tpu.memory_space<vmem>>, vector<32x96xf32>
    %cst = arith.constant dense<0.000000e+00> : vector<16x96xf32>
    %3 = tpu.matmul %1, %2, %cst {dimension_numbers = #tpu.dot_dimension_numbers<[1], [0], [0], [1], [0, 0, 1, 1], [], []>} : vector<16x32xf32>, vector<32x96xf32>, vector<16x96xf32> -> vector<16x96xf32>
    %c0_4 = arith.constant 0 : index
    %c0_5 = arith.constant 0 : index
    %4 = vector.load %arg3[%c0_4, %c0_5] : memref<1x96xf32, #tpu.memory_space<vmem>>, vector<1x96xf32>
    %5 = vector.broadcast %4 : vector<1x96xf32> to vector<16x96xf32>
    %6 = arith.addf %3, %5 : vector<16x96xf32>
    %7 = vector.extract_strided_slice %6 {offsets = [0, 0], sizes = [16, 32], strides = [1, 1]} : vector<16x96xf32> to vector<16x32xf32>
    %8 = vector.shape_cast %7 : vector<16x32xf32> to vector<8x2x4x8xf32>
    %9 = tpu.transpose %8, [1, 2, 0, 3] : vector<8x2x4x8xf32> -> vector<2x4x8x8xf32>
    %10 = vector.shape_cast %9 : vector<2x4x8x8xf32> to vector<8x8x8xf32>
    %11 = vector.extract_strided_slice %6 {offsets = [0, 32], sizes = [16, 32], strides = [1, 1]} : vector<16x96xf32> to vector<16x32xf32>
    %12 = vector.shape_cast %11 : vector<16x32xf32> to vector<8x2x4x8xf32>
    %13 = tpu.transpose %12, [1, 2, 0, 3] : vector<8x2x4x8xf32> -> vector<2x4x8x8xf32>
    %14 = vector.shape_cast %13 : vector<2x4x8x8xf32> to vector<8x8x8xf32>
    %15 = vector.extract_strided_slice %6 {offsets = [0, 64], sizes = [16, 32], strides = [1, 1]} : vector<16x96xf32> to vector<16x32xf32>
    %16 = vector.shape_cast %15 : vector<16x32xf32> to vector<8x2x4x8xf32>
    %17 = tpu.transpose %16, [1, 2, 0, 3] : vector<8x2x4x8xf32> -> vector<2x4x8x8xf32>
    %18 = vector.shape_cast %17 : vector<2x4x8x8xf32> to vector<8x8x8xf32>
    "tpu.trace_start"() <{level = 10 : i32, message = "gld,gmd->glm"}> : () -> ()
    %cst_6 = arith.constant dense<0.000000e+00> : vector<8x8x8xf32>
    %19 = tpu.matmul %10, %14, %cst_6 {dimension_numbers = #tpu.dot_dimension_numbers<[2], [2], [1], [1], [0, 0, 0, 1, 1, 1], [0], [0]>} : vector<8x8x8xf32>, vector<8x8x8xf32>, vector<8x8x8xf32> -> vector<8x8x8xf32>
    "tpu.trace_stop"() : () -> ()
    %cst_7 = arith.constant dense<0xFF800000> : vector<8x8xf32>
    %20 = vector.multi_reduction <maximumf>, %19, %cst_7 [2] : vector<8x8x8xf32> to vector<8x8xf32>
    %21 = vector.shape_cast %20 : vector<8x8xf32> to vector<8x8x1xf32>
    %22 = vector.broadcast %21 : vector<8x8x1xf32> to vector<8x8x8xf32>
    %23 = arith.subf %19, %22 : vector<8x8x8xf32>
    %24 = math.exp %23 : vector<8x8x8xf32>
    %cst_8 = arith.constant dense<0.000000e+00> : vector<8x8xf32>
    %25 = vector.multi_reduction <add>, %24, %cst_8 [2] : vector<8x8x8xf32> to vector<8x8xf32>
    %26 = vector.shape_cast %25 : vector<8x8xf32> to vector<8x8x1xf32>
    %27 = tpu.reciprocal %26 : vector<8x8x1xf32> -> vector<8x8x1xf32>
    %28 = vector.broadcast %27 : vector<8x8x1xf32> to vector<8x8x8xf32>
    %29 = arith.mulf %24, %28 : vector<8x8x8xf32>
    "tpu.trace_start"() <{level = 10 : i32, message = "glm,gmd->gld"}> : () -> ()
    %cst_9 = arith.constant dense<0.000000e+00> : vector<8x8x8xf32>
    %30 = tpu.matmul %29, %18, %cst_9 {dimension_numbers = #tpu.dot_dimension_numbers<[2], [1], [1], [2], [0, 0, 0, 1, 1, 2], [0], [0]>} : vector<8x8x8xf32>, vector<8x8x8xf32>, vector<8x8x8xf32> -> vector<8x8x8xf32>
    "tpu.trace_stop"() : () -> ()
    %31 = vector.shape_cast %30 : vector<8x8x8xf32> to vector<2x4x8x8xf32>
    %32 = tpu.transpose %31, [2, 0, 1, 3] : vector<2x4x8x8xf32> -> vector<8x2x4x8xf32>
    %33 = vector.shape_cast %32 : vector<8x2x4x8xf32> to vector<16x32xf32>
    %c0_10 = arith.constant 0 : index
    %c0_11 = arith.constant 0 : index
    %34 = vector.load %arg4[%c0_10, %c0_11] : memref<32x32xf32, #tpu.memory_space<vmem>>, vector<32x32xf32>
    %cst_12 = arith.constant dense<0.000000e+00> : vector<16x32xf32>
    %35 = tpu.matmul %33, %34, %cst_12 {dimension_numbers = #tpu.dot_dimension_numbers<[1], [0], [0], [1], [0, 0, 1, 1], [], []>} : vector<16x32xf32>, vector<32x32xf32>, vector<16x32xf32> -> vector<16x32xf32>
    %c0_13 = arith.constant 0 : index
    %c0_14 = arith.constant 0 : index
    %36 = vector.load %arg5[%c0_13, %c0_14] : memref<1x32xf32, #tpu.memory_space<vmem>>, vector<1x32xf32>
    %37 = vector.broadcast %36 : vector<1x32xf32> to vector<16x32xf32>
    %38 = arith.addf %35, %37 : vector<16x32xf32>
    %39 = arith.addf %1, %38 : vector<16x32xf32>
    %c0_15 = arith.constant 0 : index
    %c0_16 = arith.constant 0 : index
    %40 = vector.load %arg6[%c0_15, %c0_16] : memref<32x16xf32, #tpu.memory_space<vmem>>, vector<32x16xf32>
    %cst_17 = arith.constant dense<0.000000e+00> : vector<16x16xf32>
    %41 = tpu.matmul %39, %40, %cst_17 {dimension_numbers = #tpu.dot_dimension_numbers<[1], [0], [0], [1], [0, 0, 1, 1], [], []>} : vector<16x32xf32>, vector<32x16xf32>, vector<16x16xf32> -> vector<16x16xf32>
    %c0_18 = arith.constant 0 : index
    %c0_19 = arith.constant 0 : index
    %42 = vector.load %arg7[%c0_18, %c0_19] : memref<1x16xf32, #tpu.memory_space<vmem>>, vector<1x16xf32>
    %43 = vector.broadcast %42 : vector<1x16xf32> to vector<16x16xf32>
    %44 = arith.addf %41, %43 : vector<16x16xf32>
    %c0_20 = arith.constant 0 : index
    %c0_21 = arith.constant 0 : index
    %45 = vector.load %arg8[%c0_20, %c0_21] : memref<16x32xf32, #tpu.memory_space<vmem>>, vector<16x32xf32>
    %cst_22 = arith.constant dense<0.000000e+00> : vector<16x32xf32>
    %46 = tpu.matmul %44, %45, %cst_22 {dimension_numbers = #tpu.dot_dimension_numbers<[1], [0], [0], [1], [0, 0, 1, 1], [], []>} : vector<16x16xf32>, vector<16x32xf32>, vector<16x32xf32> -> vector<16x32xf32>
    %c0_23 = arith.constant 0 : index
    %c0_24 = arith.constant 0 : index
    %47 = vector.load %arg9[%c0_23, %c0_24] : memref<1x32xf32, #tpu.memory_space<vmem>>, vector<1x32xf32>
    %48 = vector.broadcast %47 : vector<1x32xf32> to vector<16x32xf32>
    %49 = arith.addf %46, %48 : vector<16x32xf32>
    %50 = arith.addf %39, %49 : vector<16x32xf32>
    %51 = vector.shape_cast %50 : vector<16x32xf32> to vector<8x2x32xf32>
    %c0_25 = arith.constant 0 : index
    %c0_26 = arith.constant 0 : index
    %c0_27 = arith.constant 0 : index
    %52 = vector.load %arg10[%c0_25, %c0_26, %c0_27] : memref<8x2x32xf32, #tpu.memory_space<vmem>>, vector<8x2x32xf32>
    tpu.vector_store %arg10[%c0_25, %c0_26, %c0_27], %51 {strides = array<i32>} : memref<8x2x32xf32, #tpu.memory_space<vmem>>, vector<8x2x32xf32>,
    return
  }
  func.func @transform_0(%arg0: i32) -> (i32, i32, i32) {
    %c0_i32 = arith.constant 0 : i32
    %c0_i32_0 = arith.constant 0 : i32
    %c0_i32_1 = arith.constant 0 : i32
    %c0_i32_2 = arith.constant 0 : i32
    return %c0_i32, %c0_i32_0, %c0_i32_1 : i32, i32, i32
  }
  func.func @transform_1(%arg0: i32) -> (i32, i32) {
    %c0_i32 = arith.constant 0 : i32
    %c0_i32_0 = arith.constant 0 : i32
    %c0_i32_1 = arith.constant 0 : i32
    return %c0_i32, %c0_i32_0 : i32, i32
  }
  func.func @transform_2(%arg0: i32) -> (i32, i32) {
    %c0_i32 = arith.constant 0 : i32
    %c0_i32_0 = arith.constant 0 : i32
    %c0_i32_1 = arith.constant 0 : i32
    return %c0_i32, %c0_i32_0 : i32, i32
  }
  func.func @transform_3(%arg0: i32) -> (i32, i32) {
    %c0_i32 = arith.constant 0 : i32
    %c0_i32_0 = arith.constant 0 : i32
    %c0_i32_1 = arith.constant 0 : i32
    return %c0_i32, %c0_i32_0 : i32, i32
  }
  func.func @transform_4(%arg0: i32) -> (i32, i32) {
    %c0_i32 = arith.constant 0 : i32
    %c0_i32_0 = arith.constant 0 : i32
    %c0_i32_1 = arith.constant 0 : i32
    return %c0_i32, %c0_i32_0 : i32, i32
  }
  func.func @transform_5(%arg0: i32) -> (i32, i32) {
    %c0_i32 = arith.constant 0 : i32
    %c0_i32_0 = arith.constant 0 : i32
    %c0_i32_1 = arith.constant 0 : i32
    return %c0_i32, %c0_i32_0 : i32, i32
  }
  func.func @transform_6(%arg0: i32) -> (i32, i32) {
    %c0_i32 = arith.constant 0 : i32
    %c0_i32_0 = arith.constant 0 : i32
    %c0_i32_1 = arith.constant 0 : i32
    return %c0_i32, %c0_i32_0 : i32, i32
  }
  func.func @transform_7(%arg0: i32) -> (i32, i32) {
    %c0_i32 = arith.constant 0 : i32
    %c0_i32_0 = arith.constant 0 : i32
    %c0_i32_1 = arith.constant 0 : i32
    return %c0_i32, %c0_i32_0 : i32, i32
  }
  func.func @transform_8(%arg0: i32) -> (i32, i32) {
    %c0_i32 = arith.constant 0 : i32
    %c0_i32_0 = arith.constant 0 : i32
    %c0_i32_1 = arith.constant 0 : i32
    return %c0_i32, %c0_i32_0 : i32, i32
  }
  func.func @transform_9(%arg0: i32) -> (i32, i32, i32) {
    %c0_i32 = arith.constant 0 : i32
    %c0_i32_0 = arith.constant 0 : i32
    %c0_i32_1 = arith.constant 0 : i32
    %c0_i32_2 = arith.constant 0 : i32
    return %c0_i32, %c0_i32_0, %c0_i32_1 : i32, i32, i32
  }
}

</mosaic_0001>

<bundles_post_ra>
// kernel: _lambda_.1
= control target key start
LH: loop header
LB: loop body
LE: loop exit
PB: predicated region body
PF: predicated region fallthrough
CT: control target
= control target key end

     0   :  { %14 = vsyncpa [#allocation3], 0  ;;  %s4167_s0 = inlined_call_operand.hbm [shape: f32[8,2,32], index: 0, kind: input, shape index: {}, may-alias: {0,9}]   ;;  %s4168_s1 = inlined_call_operand.hbm [shape: f32[32,96], index: 1, kind: input, shape index: {}]   ;;  %s4169_s2 = inlined_call_operand.hbm [shape: f32[1,96], index: 2, kind: input, shape index: {}]   ;;  %s4170_s3 = inlined_call_operand.hbm [shape: f32[32,32], index: 3, kind: input, shape index: {}]   ;;  %s4171_s4 = inlined_call_operand.hbm [shape: f32[1,32], index: 4, kind: input, shape index: {}]   ;;  %s4172_s5 = inlined_call_operand.vmem [shape: f32[32,16], index: 5, kind: input, shape index: {}]   ;;  %s4173_s6 = inlined_call_operand.vmem [shape: f32[1,16], index: 6, kind: input, shape index: {}]   ;;  %s4174_s7 = inlined_call_operand.vmem [shape: f32[16,32], index: 7, kind: input, shape index: {}]   ;;  %s4175_s8 = inlined_call_operand.vmem [shape: f32[1,32], index: 8, kind: input, shape index: {}]   ;;  %s4176_s9 = inlined_call_operand.hbm [shape: f32[8,2,32], index: 9, kind: output, shape index: {}, may-alias: {0,9}]  }
   0x1   :  { %15 = vsyncpa [#allocation6], 0 }
   0x2   :  { %16 = vsyncpa [#allocation9], 0 }
   0x3   :  { %17 = vsyncpa [#allocation4], 0  ;;  %s3604_s30 = smov [#allocation5]   ;;  %s3464_s13 = scalar_lea.hbm %s4168_s1, 512 }
   0x4   :  { %s35_s10 = sshll.u32 %s3604_s30, 4  ;;  %p3465_p0 = scmp.ne.s32.totalorder %s4168_s1, %s3464_s13  ;;  %s36_s10 = int_to_ptr.vmem [resolvable:$true] %s35_s10 }
   0x5   :  { %p3468_p1 = scmp.lt.u32.totalorder %s3464_s13, %s4168_s1 }
   0x7   :  { %p3470_p2 = pnand %p3468_p1, %p3465_p0 }
   0x9   :  { %3473 = shalt.err (!%p3470_p2)
}
   0xa   :  { %s3474_s18 = scalar_lea.vmem %s36_s10, 512  ;;  %p3479_p4 = scmp.lt.s32.totalorder %s36_s10, %s36_s10 }
   0xb   :  { %p3475_p3 = scmp.ne.s32.totalorder %s36_s10, %s3474_s18  ;;  %p3480_p5 = scmp.lt.s32.totalorder %s3474_s18, %s3474_s18 }
   0xd   :  { %p3481_p6 = por %p3480_p5, %p3479_p4 }
   0xf   :  { %p3482_p7 = pnand %p3481_p6, %p3475_p3 }
  0x11   :  { %3485 = shalt.err (!%p3482_p7)
}
  0x12   :  { %s3605_s19 = smov 128   ;;  %s3606_s20 = smov 8  }
  0x13   :  { %41 = dma.hbm_to_vmem [thread:$0]  %s4168_s1, 512, %s36_s10, [#allocation6], %s3605_s19, %s3605_s19, %s3606_s20  }
  0x14   :  { %s3607_s23 = smov [#allocation8]   ;;  %s3608_s25 = smov [#allocation2]  }
  0x15   :  { %s57_s24 = sshll.u32 %s3607_s23, 4  ;;  %s23_s26 = sshll.u32 %s3608_s25, 4  ;;  %s58_s24 = int_to_ptr.vmem [resolvable:$true] %s57_s24  ;;  %s24_s26 = int_to_ptr.vmem [resolvable:$true] %s23_s26 }
  0x16   :  { %s3486_s29 = scalar_lea.hbm %s4170_s3, 512 }
  0x17   :  { %p3487_p8 = scmp.ne.s32.totalorder %s4170_s3, %s3486_s29  ;;  %p3490_p9 = scmp.lt.u32.totalorder %s3486_s29, %s4170_s3 }
  0x19   :  { %p3492_p10 = pnand %p3490_p9, %p3487_p8 }
  0x1b   :  { %3495 = shalt.err (!%p3492_p10)
}
  0x1c   :  { %s3496_s1 = scalar_lea.vmem %s58_s24, 512  ;;  %p3501_p12 = scmp.lt.s32.totalorder %s58_s24, %s58_s24 }
  0x1d   :  { %p3497_p11 = scmp.ne.s32.totalorder %s58_s24, %s3496_s1  ;;  %p3502_p13 = scmp.lt.s32.totalorder %s3496_s1, %s3496_s1 }
  0x1f   :  { %p3503_p0 = por %p3502_p13, %p3501_p12 }
  0x21   :  { %p3504_p1 = pnand %p3503_p0, %p3497_p11 }
  0x23   :  { %3507 = shalt.err (!%p3504_p1)
}
  0x24   :  { %63 = dma.hbm_to_vmem [thread:$0]  %s4170_s3, 512, %s58_s24, [#allocation9], %s3605_s19, %s3605_s19, %s3606_s20  }
  0x25   :  { %s3508_s17 = scalar_lea.hbm %s4167_s0, 256 }
  0x26   :  { %p3509_p2 = scmp.ne.s32.totalorder %s4167_s0, %s3508_s17  ;;  %p3512_p3 = scmp.lt.u32.totalorder %s3508_s17, %s4167_s0 }
  0x28   :  { %p3514_p4 = pnand %p3512_p3, %p3509_p2 }
  0x2a   :  { %3517 = shalt.err (!%p3514_p4)
}
  0x2b   :  { %s3518_s25 = scalar_lea.vmem %s24_s26, 256  ;;  %p3523_p6 = scmp.lt.s32.totalorder %s24_s26, %s24_s26 }
  0x2c   :  { %p3519_p5 = scmp.ne.s32.totalorder %s24_s26, %s3518_s25  ;;  %p3524_p7 = scmp.lt.s32.totalorder %s3518_s25, %s3518_s25 }
  0x2e   :  { %p3525_p8 = por %p3524_p7, %p3523_p6 }
  0x30   :  { %p3526_p9 = pnand %p3525_p8, %p3519_p5 }
  0x32   :  { %3529 = shalt.err (!%p3526_p9)
}
  0x33   :  { %s3609_s3 = smov 32   ;;  %s3610_s19 = smov 2  }
  0x34   :  { %29 = dma.hbm_to_vmem [thread:$0]  %s4167_s0, 256, %s24_s26, [#allocation3], %s3609_s3, %s3609_s3, %s3610_s19  }
  0x35   :  { %s3611_s28 = smov [#allocation7]   ;;  %s3612_s30 = smov [#allocation10]  }
  0x36   :  { %s48_s29 = sshll.u32 %s3611_s28, 4  ;;  %s70_s11 = sshll.u32 %s3612_s30, 4  ;;  %s49_s29 = int_to_ptr.vmem [resolvable:$true] %s48_s29  ;;  %s71_s11 = int_to_ptr.vmem [resolvable:$true] %s70_s11 }
  0x37   :  { %s3530_s1 = scalar_lea.hbm %s4169_s2, 16 }
  0x38   :  { %p3531_p10 = scmp.ne.s32.totalorder %s4169_s2, %s3530_s1  ;;  %p3534_p11 = scmp.lt.u32.totalorder %s3530_s1, %s4169_s2 }
  0x3a   :  { %p3536_p12 = pnand %p3534_p11, %p3531_p10 }
  0x3c   :  { %3539 = shalt.err (!%p3536_p12)
}
  0x3d   :  { %s3540_s0 = scalar_lea.vmem %s49_s29, 16  ;;  %s3544_s26 = scalar_lea.vmem %s49_s29, 32 }
  0x3e   :  { %p3541_p13 = scmp.ne.s32.totalorder %s49_s29, %s3540_s0  ;;  %p3545_p0 = scmp.lt.s32.totalorder %s49_s29, %s49_s29 }
  0x3f   :  { %p3546_p1 = scmp.lt.s32.totalorder %s3544_s26, %s3540_s0 }
  0x41   :  { %p3547_p2 = por %p3546_p1, %p3545_p0 }
  0x43   :  { %p3548_p3 = pnand %p3547_p2, %p3541_p13 }
  0x45   :  { %3551 = shalt.err (!%p3548_p3)
}
  0x46   :  { %51 = dma.hbm_to_vmem [thread:$0]  %s4169_s2, 16, %s49_s29, [#allocation6]  }
  0x47   :  { %s3552_s23 = scalar_lea.hbm %s4171_s4, 16 }
  0x48   :  { %p3553_p4 = scmp.ne.s32.totalorder %s4171_s4, %s3552_s23  ;;  %p3556_p5 = scmp.lt.u32.totalorder %s3552_s23, %s4171_s4 }
  0x4a   :  { %p3558_p6 = pnand %p3556_p5, %p3553_p4 }
  0x4c   :  { %3561 = shalt.err (!%p3558_p6)
}
  0x4d   :  { %s3562_s30 = scalar_lea.vmem %s71_s11, 16  ;;  %s3566_s12 = scalar_lea.vmem %s71_s11, 32 }
  0x4e   :  { %p3563_p7 = scmp.ne.s32.totalorder %s71_s11, %s3562_s30  ;;  %p3567_p8 = scmp.lt.s32.totalorder %s71_s11, %s71_s11 }
  0x4f   :  { %p3568_p9 = scmp.lt.s32.totalorder %s3566_s12, %s3562_s30 }
  0x51   :  { %p3569_p10 = por %p3568_p9, %p3567_p8 }
  0x53   :  { %p3570_p11 = pnand %p3569_p10, %p3563_p7 }
  0x55   :  { %3573 = shalt.err (!%p3570_p11)
}
  0x56   :  { %73 = dma.hbm_to_vmem [thread:$0]  %s4171_s4, 16, %s71_s11, [#allocation9]  }
  0x57   :  { %3596 = dma.done.wait [#allocation3], 256  }
  0x58   :  { %3597 = vsyncadd [#allocation3], 4294967040 }
  0x59   :  { %3598 = dma.done.wait [#allocation6], 528  }
  0x5a   :  { %3599 = vsyncadd [#allocation6], 4294966768 }
  0x5b   :  { %3600 = dma.done.wait [#allocation9], 528  }
  0x5c   :  { %3601 = vsyncadd [#allocation9], 4294966768  ;;  %v129_v0 = vlaneseq  ;;  %v3613_v1 = vmov 1983009808   ;;  %v105_v5 = vld [vmem:[#allocation5] sm:$0xff]  ;;  %v106_v6 = vld [vmem:[#allocation5 + $0x8] sm:$0xff] }
  0x5d   :  { %v127_v2 = vunpack.c.l.s4 %v3613_v1  ;;  %v107_v7 = vld [vmem:[#allocation5 + $0x10] sm:$0xff]  ;;  %v3375_v9 = vpack.c.bf16 %v106_v6, %v105_v5  ;;  %v108_v10 = vld [vmem:[#allocation5 + $0x18] sm:$0xff]  ;;  %vm158_vm0 = vcmask 261120   ;;  %v3153_v30 = vld [vmem:[#allocation7] ss:$0 sm:$0xff]  ;;  %s3614_s4 = smov 112  }
  0x5e   :  { %v3740_v4 = vshrl.u32 %v129_v0, 7  ;;  %v97_v11 = vld [vmem:[#allocation2] sm:$0x3]  ;;  %v98_v12 = vld [vmem:[#allocation2 + $0x2] sm:$0x3]  ;;  %v3379_v13 = vpack.c.bf16 %v108_v10, %v107_v7  ;;  %s3615_s11 = smov 120  }
  0x5f   :  { %v128_v3 = vunpack.c.0.s8 %v127_v2  ;;  %v99_v14 = vld [vmem:[#allocation2 + $0x4] sm:$0x3]  ;;  %v100_v15 = vld [vmem:[#allocation2 + $0x6] sm:$0x3]  ;;  %v124_v16 = vcombine.low %v97_v11, %v98_v12  ;;  %v101_v17 = vld [vmem:[#allocation2 + $0x8] sm:$0x3]  ;;  %3376 = vmatprep.subr.bf16.mxu0 %v3375_v9 }
  0x60   :  { %v125_v18 = vcombine.low %v99_v14, %v100_v15  ;;  %v102_v19 = vld [vmem:[#allocation2 + $0xa] sm:$0x3]  ;;  %v103_v20 = vld [vmem:[#allocation2 + $0xc] sm:$0x3]  ;;  %v104_v21 = vld [vmem:[#allocation2 + $0xe] sm:$0x3]  ;;  %3378 = vmatpush3.bf16.msra.mxu0 %v3375_v9 }
  0x61   :  { %v3743_v8 = vsub.s32 %v128_v3, %v3740_v4  ;;  %v141_v23 = vcombine.low %v101_v17, %v102_v19  ;;  %v142_v24 = vcombine.low %v103_v20, %v104_v21  ;;  %3380 = vmatprep.subr.bf16.mxu0 %v3379_v13  ;;  %s3616_s13 = smov 104   ;;  %s3617_s1 = smov 96   ;;  %v3618_v41 = vmov 0.0  }
  0x62   :  { %3266 = vmatprep.subr.mxu1 %v3618_v41  ;;  %vm3619_vm1 = vmmov 0   ;;  %v3620_v42 = vmov 1934713408   ;;  %vm1122_vm2 = vcmask 64512   ;;  %s3621_s10 = smov 64   ;;  %s3622_s14 = smov 24  }
  0x63   :  { %v132_v22 = vrot.slane %v124_v16, %v3743_v8  ;;  %v139_v25 = vrot.slane %v125_v18, %v3743_v8  ;;  %v149_v26 = vrot.slane %v141_v23, %v3743_v8  ;;  %v156_v27 = vrot.slane %v142_v24, %v3743_v8  ;;  %3268 = vmatprep.mubr.msk.f32.mxu1 %vm3619_vm1, %v3618_v41  ;;  %s3623_s15 = smov 16  }
  0x64   :  { %3382 = vmatpush3.bf16.msra.mxu0 %v3379_v13  ;;  %v293_v43 = vunpack.c.l.s4 %v3620_v42  ;;  %vm2701_vm3 = vcmask 130048   ;;  %vm2704_vm4 = vcmask 195584   ;;  %vm3125_vm5 = vcmask 254976  }
  0x65   :  { %v140_v28 = vcombine.low %v132_v22, %v139_v25  ;;  %v157_v29 = vcombine.low %v149_v26, %v156_v27  ;;  %3276 = vmatprep.subr.mxu0 %v3618_v41 }
  0x66   :  { %v294_v52 = vunpack.c.0.s8 %v293_v43 }
  0x67   :  { %3263 = vmatprep.mubr.msk.f32.mxu0 %vm158_vm0, %v140_v28 }
  0x68   :  { %3264 = vmatmul.mubr.msk.f32.vlgmr.msra.gmra.mrb[0].mxu0 %vm158_vm0, %v157_v29  ;;  %v3812_v62 = vsub.s32 %v294_v52, %v3740_v4 }
  0x69   :  { %3278 = vmatprep.mubr.msk.f32.mxu0 %vm3619_vm1, %v3618_v41 }
 0x13b   :  { %v3265_v31 = vpop.f32.mrb[0].mxu0 }
 0x13c   :  { %v3751_v32 = vadd.f32 %v3265_v31, %v3153_v30  ;;  %v229_v33 = vpop.f32.mrb[1].mxu0 }
 0x13d   :  { %v3755_v34 = vadd.f32 %v3153_v30, %v229_v33 }
 0x13e   :  { %248 = vrot.lane.b32.xlu1 %v3751_v32, %s3614_s4  ;;  %242 = vrot.lane.b32.xlu0 %v3751_v32, %s3615_s11 }
 0x142   :  { %246 = vrot.lane.b32.xlu1 %v3755_v34, %s3614_s4  ;;  %240 = vrot.lane.b32.xlu0 %v3755_v34, %s3615_s11 }
 0x146   :  { %254 = vrot.lane.b32.xlu1 %v3751_v32, %s3616_s13  ;;  %252 = vrot.lane.b32.xlu0 %v3755_v34, %s3616_s13 }
 0x14a   :  { %532 = vrot.lane.b32.xlu1 %v3751_v32, %s3617_s1  ;;  %530 = vrot.lane.b32.xlu0 %v3755_v34, %s3617_s1 }
 0x1b0   :  { %v3763_v35 = vpop.permute.xlu1 %248  ;;  %v3765_v36 = vpop.permute.xlu0 %242 }
 0x1b1   :  { %536 = vrot.lane.b32.xlu1 %v3765_v36, %s3617_s1  ;;  %v326_v48 = vcombine.low %v3751_v32, %v3763_v35  ;;  %v327_v49 = vcombine.high %v3751_v32, %v3763_v35 }
 0x1b3   :  { %v334_v58 = vrot.slane %v326_v48, %v3743_v8  ;;  %v341_v59 = vrot.slane %v327_v49, %v3743_v8 }
 0x1b4   :  { %v3768_v37 = vpop.permute.xlu1 %246  ;;  %v3770_v38 = vpop.permute.xlu0 %240 }
 0x1b5   :  { %540 = vrot.lane.b32.xlu1 %v3763_v35, %s3617_s1  ;;  %534 = vrot.lane.b32.xlu0 %v3770_v38, %s3617_s1  ;;  %v258_v50 = vcombine.low %v3755_v34, %v3768_v37  ;;  %v259_v51 = vcombine.high %v3755_v34, %v3768_v37 }
 0x1b7   :  { %v266_v60 = vrot.slane %v258_v50, %v3743_v8  ;;  %v273_v61 = vrot.slane %v259_v51, %v3743_v8 }
 0x1b8   :  { %v3774_v39 = vpop.permute.xlu1 %254  ;;  %v3778_v40 = vpop.permute.xlu0 %252 }
 0x1b9   :  { %544 = vrot.lane.b32.xlu1 %v3774_v39, %s3617_s1  ;;  %538 = vrot.lane.b32.xlu0 %v3768_v37, %s3617_s1  ;;  %v342_v44 = vcombine.low %v3765_v36, %v3774_v39  ;;  %v343_v45 = vcombine.high %v3765_v36, %v3774_v39  ;;  %v274_v46 = vcombine.low %v3770_v38, %v3778_v40 }
 0x1ba   :  { %v275_v47 = vcombine.high %v3770_v38, %v3778_v40 }
 0x1bb   :  { %v350_v54 = vrot.slane %v342_v44, %v3743_v8  ;;  %v357_v55 = vrot.slane %v343_v45, %v3743_v8  ;;  %v282_v56 = vrot.slane %v274_v46, %v3743_v8 }
 0x1bc   :  { %v533_v53 = vpop.permute.xlu1 %532  ;;  %v289_v57 = vrot.slane %v275_v47, %v3743_v8  ;;  %v531_v63 = vpop.permute.xlu0 %530 }
 0x1bd   :  { %542 = vrot.lane.b32.xlu0 %v3778_v40, %s3617_s1  ;;  %v358_v1 = vcombine.low %v334_v58, %v350_v54  ;;  %v359_v2 = vcombine.high %v334_v58, %v350_v54  ;;  %v374_v3 = vcombine.low %v341_v59, %v357_v55  ;;  %v375_v5 = vcombine.high %v341_v59, %v357_v55 }
 0x1be   :  { %v290_v6 = vcombine.low %v266_v60, %v282_v56  ;;  %v291_v7 = vcombine.high %v266_v60, %v282_v56  ;;  %v306_v9 = vcombine.low %v273_v61, %v289_v57  ;;  %v307_v10 = vcombine.high %v273_v61, %v289_v57 }
 0x1bf   :  { %v3815_v13 = vrot.slane %v358_v1, %v3812_v62  ;;  %v3818_v14 = vrot.slane %v359_v2, %v3812_v62  ;;  %v382_v4 = vrot.slane %v374_v3, %v3812_v62  ;;  %v389_v15 = vrot.slane %v375_v5, %v3812_v62 }
 0x1c0   :  { %v298_v16 = vrot.slane %v290_v6, %v3812_v62  ;;  %v305_v17 = vrot.slane %v291_v7, %v3812_v62  ;;  %v314_v18 = vrot.slane %v306_v9, %v3812_v62  ;;  %v321_v19 = vrot.slane %v307_v10, %v3812_v62 }
 0x1c1   :  { %v410_v23 = vcombine.low %v3815_v13, %v382_v4  ;;  %v418_v24 = vcombine.low %v3818_v14, %v389_v15  ;;  %v3158_v28 = vcombine.high %v3815_v13, %v382_v4  ;;  %v3159_v29 = vcombine.high %v3818_v14, %v389_v15 }
 0x1c2   :  { %v394_v30 = vcombine.low %v298_v16, %v314_v18  ;;  %v402_v31 = vcombine.low %v305_v17, %v321_v19  ;;  %v3156_v45 = vcombine.high %v298_v16, %v314_v18  ;;  %v3157_v46 = vcombine.high %v305_v17, %v321_v19 }
 0x1c3   :  { %v3835_v54 = vrot.slane %v3158_v28, %v3743_v8  ;;  %v3838_v55 = vrot.slane %v3159_v29, %v3743_v8 }
 0x1c4   :  { %v3849_v3 = vrot.slane %v3156_v45, %v3743_v8  ;;  %v3852_v5 = vrot.slane %v3157_v46, %v3743_v8 }
 0x223   :  { %v537_v0 = vpop.permute.xlu1 %536 }
 0x227   :  { %v541_v11 = vpop.permute.xlu1 %540  ;;  %v535_v12 = vpop.permute.xlu0 %534 }
 0x228   :  { %v622_v20 = vcombine.low %v533_v53, %v541_v11  ;;  %v623_v21 = vcombine.high %v533_v53, %v541_v11 }
 0x22a   :  { %v630_v33 = vrot.slane %v622_v20, %v3743_v8  ;;  %v637_v42 = vrot.slane %v623_v21, %v3743_v8  ;;  %v401_v20 = vrot.slane %v394_v30, %v3743_v8  ;;  %v409_v21 = vrot.slane %v402_v31, %v3743_v8 }
 0x22b   :  { %v545_v22 = vpop.permute.xlu1 %544  ;;  %v539_v27 = vpop.permute.xlu0 %538 }
 0x22c   :  { %v638_v25 = vcombine.low %v537_v0, %v545_v22  ;;  %v639_v26 = vcombine.high %v537_v0, %v545_v22  ;;  %v554_v47 = vcombine.low %v531_v63, %v539_v27  ;;  %v555_v48 = vcombine.high %v531_v63, %v539_v27 }
 0x22d   :  { %v417_v22 = vrot.slane %v410_v23, %v3743_v8  ;;  %v426_v46 = vcombine.low %v401_v20, %v409_v21 }
 0x22e   :  { %v646_v43 = vrot.slane %v638_v25, %v3743_v8  ;;  %v653_v44 = vrot.slane %v639_v26, %v3743_v8  ;;  %v562_v63 = vrot.slane %v554_v47, %v3743_v8  ;;  %v569_v0 = vrot.slane %v555_v48, %v3743_v8 }
 0x22f   :  { %v543_v53 = vpop.permute.xlu0 %542  ;;  %v425_v25 = vrot.slane %v418_v24, %v3743_v8  ;;  %v427_v24 = vcombine.high %v401_v20, %v409_v21 }
 0x230   :  { %v654_v49 = vcombine.low %v630_v33, %v646_v43  ;;  %v655_v50 = vcombine.high %v630_v33, %v646_v43  ;;  %v670_v51 = vcombine.low %v637_v42, %v653_v44  ;;  %v671_v52 = vcombine.high %v637_v42, %v653_v44 }
 0x231   :  { %v570_v56 = vcombine.low %v535_v12, %v543_v53  ;;  %v571_v57 = vcombine.high %v535_v12, %v543_v53  ;;  %v442_v47 = vcombine.low %v417_v22, %v425_v25  ;;  %v443_v48 = vcombine.high %v417_v22, %v425_v25 }
 0x232   :  { %v662_v58 = vrot.slane %v654_v49, %v3812_v62  ;;  %v669_v59 = vrot.slane %v655_v50, %v3812_v62  ;;  %v678_v60 = vrot.slane %v670_v51, %v3812_v62  ;;  %v685_v61 = vrot.slane %v671_v52, %v3812_v62 }
 0x233   :  { %v578_v1 = vrot.slane %v570_v56, %v3743_v8  ;;  %v585_v2 = vrot.slane %v571_v57, %v3743_v8  ;;  %v494_v53 = vcombine.low %v3849_v3, %v3852_v5  ;;  %v510_v56 = vcombine.low %v3835_v54, %v3838_v55 }
 0x234   :  { %v706_v6 = vcombine.low %v662_v58, %v678_v60  ;;  %v714_v7 = vcombine.low %v669_v59, %v685_v61  ;;  %v3162_v13 = vcombine.high %v662_v58, %v678_v60  ;;  %v3163_v14 = vcombine.high %v669_v59, %v685_v61 }
 0x235   :  { %v586_v9 = vcombine.low %v562_v63, %v578_v1  ;;  %v587_v10 = vcombine.high %v562_v63, %v578_v1  ;;  %v602_v11 = vcombine.low %v569_v0, %v585_v2  ;;  %v603_v12 = vcombine.high %v569_v0, %v585_v2 }
 0x236   :  { %v713_v4 = vrot.slane %v706_v6, %v3743_v8  ;;  %v721_v15 = vrot.slane %v714_v7, %v3743_v8  ;;  %v781_v33 = vrot.slane %v3162_v13, %v3743_v8  ;;  %v789_v42 = vrot.slane %v3163_v14, %v3743_v8 }
 0x237   :  { %v594_v16 = vrot.slane %v586_v9, %v3812_v62  ;;  %v601_v17 = vrot.slane %v587_v10, %v3812_v62  ;;  %v610_v18 = vrot.slane %v602_v11, %v3812_v62  ;;  %v617_v19 = vrot.slane %v603_v12, %v3812_v62 }
 0x238   :  { %v738_v43 = vcombine.low %v713_v4, %v721_v15  ;;  %v739_v44 = vcombine.high %v713_v4, %v721_v15  ;;  %v806_v52 = vcombine.low %v781_v33, %v789_v42  ;;  %v434_v61 = vrot.slane %v426_v46, %v3812_v62 }
 0x239   :  { %v690_v26 = vcombine.low %v594_v16, %v610_v18  ;;  %v698_v27 = vcombine.low %v601_v17, %v617_v19  ;;  %v3160_v28 = vcombine.high %v594_v16, %v610_v18  ;;  %v3161_v29 = vcombine.high %v601_v17, %v617_v19 }
 0x23a   :  { %v746_v58 = vrot.slane %v738_v43, %v3812_v62  ;;  %v753_v60 = vrot.slane %v739_v44, %v3812_v62  ;;  %v450_v63 = vrot.slane %v442_v47, %v3812_v62  ;;  %v441_v0 = vrot.slane %v427_v24, %v3812_v62 }
 0x23b   :  { %v765_v45 = vrot.slane %v3160_v28, %v3743_v8  ;;  %v773_v30 = vrot.slane %v3161_v29, %v3743_v8  ;;  %v697_v31 = vrot.slane %v690_v26, %v3743_v8  ;;  %v705_v23 = vrot.slane %v698_v27, %v3743_v8 }
 0x23c   :  { %v457_v1 = vrot.slane %v443_v48, %v3812_v62  ;;  %v495_v10 = vcombine.high %v3849_v3, %v3852_v5  ;;  %v511_v11 = vcombine.high %v3835_v54, %v3838_v55  ;;  %v807_v12 = vcombine.high %v781_v33, %v789_v42 }
 0x23d   :  { %v790_v49 = vcombine.low %v765_v45, %v773_v30  ;;  %v722_v50 = vcombine.low %v697_v31, %v705_v23  ;;  %v723_v51 = vcombine.high %v697_v31, %v705_v23  ;;  %v791_v2 = vcombine.high %v765_v45, %v773_v30 }
 0x23e   :  { %v814_v13 = vrot.slane %v806_v52, %v3812_v62  ;;  %v502_v14 = vrot.slane %v494_v53, %v3812_v62  ;;  %v458_v4 = vcombine.low %v434_v61, %v450_v63  ;;  %v460_v15 = vcombine.low %v441_v0, %v457_v1 }
 0x23f   :  { %v730_v57 = vrot.slane %v722_v50, %v3812_v62  ;;  %v737_v59 = vrot.slane %v723_v51, %v3812_v62  ;;  %v798_v9 = vrot.slane %v790_v49, %v3812_v62  ;;  %v518_v3 = vrot.slane %v510_v56, %v3812_v62 }
 0x240   :  { %v805_v54 = vrot.slane %v791_v2, %v3812_v62  ;;  %v821_v55 = vrot.slane %v807_v12, %v3812_v62  ;;  %v509_v17 = vrot.slane %v495_v10, %v3812_v62  ;;  %v459_v18 = vcombine.high %v434_v61, %v450_v63 }
 0x241   :  { %v754_v6 = vcombine.low %v730_v57, %v746_v58  ;;  %v756_v7 = vcombine.low %v737_v59, %v753_v60  ;;  %v755_v5 = vcombine.high %v730_v57, %v746_v58  ;;  %v822_v16 = vcombine.low %v798_v9, %v814_v13 }
 0x242   :  { %v526_v19 = vcombine.low %v502_v14, %v518_v3  ;;  %v525_v20 = vrot.slane %v511_v11, %v3812_v62  ;;  %v757_v21 = vcombine.high %v737_v59, %v753_v60  ;;  %v824_v22 = vcombine.low %v805_v54, %v821_v55 }
 0x243   :  { %3267 = vmatpush3.xpose.msk.msra.mxu1 %vm1122_vm2, %v754_v6  ;;  %3277 = vmatpush3.xpose.msk.msra.mxu0 %vm1122_vm2, %v756_v7  ;;  %v461_v25 = vcombine.high %v441_v0, %v457_v1  ;;  %v823_v27 = vcombine.high %v798_v9, %v814_v13  ;;  %v527_v28 = vcombine.high %v502_v14, %v518_v3 }
 0x244   :  { %3271 = vmatprep.subr.mxu1 %v3618_v41  ;;  %3286 = vmatprep.subr.mxu0 %v3618_v41  ;;  %v528_v26 = vcombine.low %v509_v17, %v525_v20  ;;  %v825_v29 = vcombine.high %v805_v54, %v821_v55  ;;  %v529_v33 = vcombine.high %v509_v17, %v525_v20 }
 0x246   :  { %3269 = vmatmul.mubr.msk.f32.vlgmr.msra.gmra.mrb[0].mxu1 %vm1122_vm2, %v458_v4  ;;  %3279 = vmatmul.mubr.msk.f32.vlgmr.msra.gmra.mrb[2].mxu0 %vm1122_vm2, %v460_v15 }
 0x247   :  { %3272 = vmatpush3.xpose.msk.msra.mxu1 %vm1122_vm2, %v755_v5  ;;  %3287 = vmatpush3.xpose.msk.msra.mxu0 %vm1122_vm2, %v822_v16 }
 0x248   :  { %3273 = vmatprep.mubr.msk.f32.mxu1 %vm3619_vm1, %v3618_v41  ;;  %3288 = vmatprep.mubr.msk.f32.mxu0 %vm3619_vm1, %v3618_v41 }
 0x249   :  { %3281 = vmatprep.subr.mxu1 %v3618_v41  ;;  %3296 = vmatprep.subr.mxu0 %v3618_v41 }
 0x24a   :  { %3274 = vmatmul.mubr.msk.f32.vlgmr.msra.gmra.mrb[2].mxu1 %vm1122_vm2, %v459_v18  ;;  %3289 = vmatmul.mubr.msk.f32.vlgmr.msra.gmra.mrb[4].mxu0 %vm1122_vm2, %v526_v19 }
 0x24b   :  { %3282 = vmatpush3.xpose.msk.msra.mxu1 %vm1122_vm2, %v757_v21  ;;  %3297 = vmatpush3.xpose.msk.msra.mxu0 %vm1122_vm2, %v824_v22 }
 0x24c   :  { %3283 = vmatprep.mubr.msk.f32.mxu1 %vm3619_vm1, %v3618_v41  ;;  %3298 = vmatprep.mubr.msk.f32.mxu0 %vm3619_vm1, %v3618_v41 }
 0x24d   :  { %3291 = vmatprep.subr.mxu1 %v3618_v41  ;;  %3306 = vmatprep.subr.mxu0 %v3618_v41 }
 0x24e   :  { %3284 = vmatmul.mubr.msk.f32.vlgmr.msra.gmra.mrb[4].mxu1 %vm1122_vm2, %v461_v25  ;;  %3299 = vmatmul.mubr.msk.f32.vlgmr.msra.gmra.mrb[6].mxu0 %vm1122_vm2, %v528_v26 }
 0x24f   :  { %3292 = vmatpush3.xpose.msk.msra.mxu1 %vm1122_vm2, %v823_v27  ;;  %3293 = vmatprep.mubr.msk.f32.mxu1 %vm3619_vm1, %v3618_v41 }
 0x250   :  { %3301 = vmatprep.subr.mxu1 %v3618_v41  ;;  %3308 = vmatprep.mubr.msk.f32.mxu0 %vm3619_vm1, %v3618_v41 }
 0x252   :  { %3294 = vmatmul.mubr.msk.f32.vlgmr.msra.gmra.mrb[6].mxu1 %vm1122_vm2, %v527_v28 }
 0x253   :  { %3302 = vmatpush3.xpose.msk.msra.mxu1 %vm1122_vm2, %v825_v29  ;;  %3303 = vmatprep.mubr.msk.f32.mxu1 %vm3619_vm1, %v3618_v41 }
 0x254   :  { %3311 = vmatprep.subr.mxu1 %v3618_v41 }
 0x256   :  { %3304 = vmatmul.mubr.msk.f32.vlgmr.msra.gmra.mrb[8].mxu1 %vm1122_vm2, %v529_v33 }
 0x257   :  { %3313 = vmatprep.mubr.msk.f32.mxu1 %vm3619_vm1, %v3618_v41 }
 0x319   :  { %v1195_v42 = vpop.f32.mrb[0].mxu1  ;;  %v1347_v43 = vpop.f32.mrb[2].mxu0 }
 0x31a   :  { %v3270_v44 = vpop.f32.mrb[1].mxu1  ;;  %v3280_v45 = vpop.f32.mrb[3].mxu0  ;;  %v1731_v30 = vsel %vm1122_vm2, %v1195_v42, -inf  ;;  %v1737_v47 = vsel %vm1122_vm2, %v1347_v43, -inf }
 0x31b   :  { %1732 = vmax.xlane.f32.xlu0 %v1731_v30 }
 0x31d   :  { %v1271_v31 = vpop.f32.mrb[2].mxu1  ;;  %v1499_v23 = vpop.f32.mrb[4].mxu0 }
 0x31e   :  { %v3275_v46 = vpop.f32.mrb[3].mxu1  ;;  %v3290_v24 = vpop.f32.mrb[5].mxu0  ;;  %v1734_v48 = vsel %vm1122_vm2, %v1271_v31, -inf  ;;  %v1743_v53 = vsel %vm1122_vm2, %v1499_v23, -inf }
 0x31f   :  { %1738 = vmax.xlane.f32.xlu0 %v1737_v47  ;;  %1735 = vmax.xlane.f32.xlu1 %v1734_v48 }
 0x321   :  { %v1423_v49 = vpop.f32.mrb[4].mxu1  ;;  %v1651_v50 = vpop.f32.mrb[6].mxu0 }
 0x322   :  { %v3285_v51 = vpop.f32.mrb[5].mxu1  ;;  %v3300_v52 = vpop.f32.mrb[7].mxu0  ;;  %v1740_v56 = vsel %vm1122_vm2, %v1423_v49, -inf  ;;  %v1749_v59 = vsel %vm1122_vm2, %v1651_v50, -inf }
 0x323   :  { %1744 = vmax.xlane.f32.xlu1 %v1743_v53  ;;  %1741 = vmax.xlane.f32.xlu0 %v1740_v56 }
 0x325   :  { %v1575_v57 = vpop.f32.mrb[6].mxu1 }
 0x326   :  { %v3295_v58 = vpop.f32.mrb[7].mxu1  ;;  %v1746_v60 = vsel %vm1122_vm2, %v1575_v57, -inf }
 0x327   :  { %1750 = vmax.xlane.f32.xlu1 %v1749_v59  ;;  %1747 = vmax.xlane.f32.xlu0 %v1746_v60 }
 0x329   :  { %v1727_v61 = vpop.f32.mrb[8].mxu1 }
 0x32a   :  { %v3305_v63 = vpop.f32.mrb[9].mxu1  ;;  %v1752_v0 = vsel %vm1122_vm2, %v1727_v61, -inf }
 0x32b   :  { %1753 = vmax.xlane.f32.xlu0 %v1752_v0 }
 0x338   :  { %826 = vrot.lane.b32.xlu1 %v3755_v34, %s3621_s10 }
 0x33c   :  { %830 = vrot.lane.b32.xlu1 %v3770_v38, %s3621_s10 }
 0x340   :  { %832 = vrot.lane.b32.xlu1 %v3765_v36, %s3621_s10 }
 0x341   :  { %828 = vrot.lane.b32.xlu0 %v3751_v32, %s3621_s10 }
 0x344   :  { %836 = vrot.lane.b32.xlu1 %v3763_v35, %s3621_s10 }
 0x345   :  { %834 = vrot.lane.b32.xlu0 %v3768_v37, %s3621_s10 }
 0x348   :  { %840 = vrot.lane.b32.xlu1 %v3774_v39, %s3621_s10 }
 0x349   :  { %838 = vrot.lane.b32.xlu0 %v3778_v40, %s3621_s10 }
 0x3a8   :  { %v1733_v1 = vpop.xlane.xlu0 %1732 }
 0x3a9   :  { %v1755_v2 = vsub.f32 %v1195_v42, %v1733_v1 }
 0x3ab   :  { %v1763_v6 = vmul.f32 1.442695, %v1755_v2 }
 0x3ac   :  { %v1739_v7 = vpop.xlane.xlu0 %1738  ;;  %v1736_v9 = vpop.xlane.xlu1 %1735 }
 0x3ad   :  { %3424 = vpow2.f32 %v1763_v6  ;;  %v1757_v34 = vsub.f32 %v1347_v43, %v1739_v7  ;;  %v1756_v38 = vsub.f32 %v1271_v31, %v1736_v9 }
 0x3af   :  { %v1767_v10 = vmul.f32 1.442695, %v1757_v34  ;;  %v1765_v36 = vmul.f32 1.442695, %v1756_v38 }
 0x3b0   :  { %v1745_v11 = vpop.xlane.xlu1 %1744  ;;  %v1742_v32 = vpop.xlane.xlu0 %1741 }
 0x3b1   :  { %3426 = vpow2.f32 %v1767_v10  ;;  %v1759_v35 = vsub.f32 %v1499_v23, %v1745_v11  ;;  %v1758_v12 = vsub.f32 %v1423_v49, %v1742_v32 }
 0x3b2   :  { %3428 = vpow2.f32 %v1765_v36 }
 0x3b3   :  { %v1771_v37 = vmul.f32 1.442695, %v1759_v35  ;;  %v1769_v39 = vmul.f32 1.442695, %v1758_v12 }
 0x3b4   :  { %v1751_v13 = vpop.xlane.xlu1 %1750  ;;  %v1748_v40 = vpop.xlane.xlu0 %1747 }
 0x3b5   :  { %3430 = vpow2.f32 %v1771_v37  ;;  %v1761_v14 = vsub.f32 %v1651_v50, %v1751_v13  ;;  %v1760_v4 = vsub.f32 %v1575_v57, %v1748_v40 }
 0x3b6   :  { %3432 = vpow2.f32 %v1769_v39 }
 0x3b7   :  { %v3950_v15 = vpop.eup %3424  ;;  %v1775_v3 = vmul.f32 1.442695, %v1761_v14  ;;  %v1773_v5 = vmul.f32 1.442695, %v1760_v4 }
 0x3b8   :  { %v827_v16 = vpop.permute.xlu1 %826  ;;  %v1754_v54 = vpop.xlane.xlu0 %1753  ;;  %v1779_v55 = vsel %vm1122_vm2, %v3950_v15, 0.0 }
 0x3b9   :  { %v1762_v17 = vsub.f32 %v1727_v61, %v1754_v54  ;;  %1780 = vadd.xlane.f32.xlu1 %v1779_v55  ;;  %3434 = vpow2.f32 %v1773_v5 }
 0x3ba   :  { %3436 = vpow2.f32 %v1775_v3 }
 0x3bb   :  { %v3954_v18 = vpop.eup %3426  ;;  %v1777_v19 = vmul.f32 1.442695, %v1762_v17 }
 0x3bc   :  { %v3956_v20 = vpop.eup %3428  ;;  %v831_v21 = vpop.permute.xlu1 %830  ;;  %v1785_v25 = vsel %vm1122_vm2, %v3954_v18, 0.0 }
 0x3bd   :  { %v829_v22 = vpop.permute.xlu0 %828  ;;  %1786 = vadd.xlane.f32.xlu1 %v1785_v25  ;;  %v1782_v26 = vsel %vm1122_vm2, %v3956_v20, 0.0  ;;  %3438 = vpow2.f32 %v1777_v19 }
 0x3be   :  { %1783 = vadd.xlane.f32.xlu0 %v1782_v26 }
 0x3bf   :  { %v3962_v27 = vpop.eup %3430 }
 0x3c0   :  { %v833_v28 = vpop.permute.xlu1 %832  ;;  %v1791_v33 = vsel %vm1122_vm2, %v3962_v27, 0.0  ;;  %v3966_v42 = vpop.eup %3432 }
 0x3c1   :  { %v835_v29 = vpop.permute.xlu0 %834  ;;  %v1788_v47 = vsel %vm1122_vm2, %v3966_v42, 0.0 }
 0x3c2   :  { %1792 = vadd.xlane.f32.xlu0 %v1791_v33  ;;  %v850_v43 = vcombine.low %v827_v16, %v835_v29  ;;  %v851_v44 = vcombine.high %v827_v16, %v835_v29 }
 0x3c3   :  { %v3968_v45 = vpop.eup %3434 }
 0x3c4   :  { %v837_v30 = vpop.permute.xlu1 %836  ;;  %v3970_v23 = vpop.eup %3436  ;;  %v1794_v49 = vsel %vm1122_vm2, %v3968_v45, 0.0  ;;  %v858_v50 = vrot.slane %v850_v43, %v3743_v8  ;;  %v865_v51 = vrot.slane %v851_v44, %v3743_v8 }
 0x3c5   :  { %v839_v31 = vpop.permute.xlu0 %838  ;;  %v918_v48 = vcombine.low %v829_v22, %v837_v30  ;;  %1795 = vadd.xlane.f32.xlu1 %v1794_v49  ;;  %v919_v56 = vcombine.high %v829_v22, %v837_v30  ;;  %v1797_v58 = vsel %vm1122_vm2, %v3970_v23, 0.0 }
 0x3c6   :  { %v866_v46 = vcombine.low %v831_v21, %v839_v31  ;;  %v867_v24 = vcombine.high %v831_v21, %v839_v31  ;;  %1789 = vadd.xlane.f32.xlu0 %v1788_v47 }
 0x3c7   :  { %v3982_v59 = vpop.eup %3438  ;;  %v926_v1 = vrot.slane %v918_v48, %v3743_v8  ;;  %v933_v10 = vrot.slane %v919_v56, %v3743_v8 }
 0x3c8   :  { %v874_v52 = vrot.slane %v866_v46, %v3743_v8  ;;  %v881_v53 = vrot.slane %v867_v24, %v3743_v8  ;;  %v841_v57 = vpop.permute.xlu1 %840  ;;  %v1800_v32 = vsel %vm1122_vm2, %v3982_v59, 0.0 }
 0x3c9   :  { %v934_v2 = vcombine.low %v833_v28, %v841_v57  ;;  %v935_v6 = vcombine.high %v833_v28, %v841_v57 }
 0x3ca   :  { %v882_v60 = vcombine.low %v858_v50, %v874_v52  ;;  %v883_v61 = vcombine.high %v858_v50, %v874_v52  ;;  %v898_v63 = vcombine.low %v865_v51, %v881_v53  ;;  %v899_v0 = vcombine.high %v865_v51, %v881_v53  ;;  %1798 = vadd.xlane.f32.xlu0 %v1797_v58 }
 0x3cb   :  { %v942_v36 = vrot.slane %v934_v2, %v3743_v8  ;;  %v949_v11 = vrot.slane %v935_v6, %v3743_v8 }
 0x3cc   :  { %v890_v7 = vrot.slane %v882_v60, %v3812_v62  ;;  %v897_v9 = vrot.slane %v883_v61, %v3812_v62  ;;  %v906_v34 = vrot.slane %v898_v63, %v3812_v62  ;;  %v913_v38 = vrot.slane %v899_v0, %v3812_v62 }
 0x3cd   :  { %v950_v13 = vcombine.low %v926_v1, %v942_v36  ;;  %v951_v40 = vcombine.high %v926_v1, %v942_v36  ;;  %v966_v14 = vcombine.low %v933_v10, %v949_v11  ;;  %v967_v4 = vcombine.high %v933_v10, %v949_v11 }
 0x3ce   :  { %v986_v35 = vcombine.low %v890_v7, %v906_v34  ;;  %v994_v12 = vcombine.low %v897_v9, %v913_v38  ;;  %v3164_v37 = vcombine.high %v890_v7, %v906_v34  ;;  %v3165_v39 = vcombine.high %v897_v9, %v913_v38  ;;  %1801 = vadd.xlane.f32.xlu0 %v1800_v32 }
 0x3cf   :  { %v958_v55 = vrot.slane %v950_v13, %v3812_v62  ;;  %v965_v17 = vrot.slane %v951_v40, %v3812_v62  ;;  %v974_v19 = vrot.slane %v966_v14, %v3812_v62  ;;  %v981_v21 = vrot.slane %v967_v4, %v3812_v62 }
 0x3d0   :  { %v993_v3 = vrot.slane %v986_v35, %v3743_v8  ;;  %v1001_v5 = vrot.slane %v994_v12, %v3743_v8  ;;  %v1061_v16 = vrot.slane %v3164_v37, %v3743_v8  ;;  %v1069_v54 = vrot.slane %v3165_v39, %v3743_v8 }
 0x3d1   :  { %v1002_v28 = vcombine.low %v958_v55, %v974_v19  ;;  %v1010_v29 = vcombine.low %v965_v17, %v981_v21  ;;  %v3166_v33 = vcombine.high %v958_v55, %v974_v19  ;;  %v3167_v43 = vcombine.high %v965_v17, %v981_v21 }
 0x3d2   :  { %v1019_v22 = vcombine.high %v993_v3, %v1001_v5  ;;  %v1086_v25 = vcombine.low %v1061_v16, %v1069_v54  ;;  %v1087_v26 = vcombine.high %v1061_v16, %v1069_v54  ;;  %v1018_v44 = vcombine.low %v993_v3, %v1001_v5 }
 0x3d3   :  { %v1009_v30 = vrot.slane %v1002_v28, %v3743_v8  ;;  %v1017_v31 = vrot.slane %v1010_v29, %v3743_v8  ;;  %v1077_v46 = vrot.slane %v3166_v33, %v3743_v8  ;;  %v1085_v24 = vrot.slane %v3167_v43, %v3743_v8 }
 0x3d4   :  { %v1026_v51 = vrot.slane %v1018_v44, %v3812_v62  ;;  %v1033_v52 = vrot.slane %v1019_v22, %v3812_v62  ;;  %v1094_v60 = vrot.slane %v1086_v25, %v3812_v62  ;;  %v4016_v61 = vrot.slane %v1087_v26, %v3812_v62 }
 0x3d5   :  { %v1034_v47 = vcombine.low %v1009_v30, %v1017_v31  ;;  %v1035_v48 = vcombine.high %v1009_v30, %v1017_v31  ;;  %v1102_v49 = vcombine.low %v1077_v46, %v1085_v24  ;;  %v1103_v50 = vcombine.high %v1077_v46, %v1085_v24 }
 0x3d7   :  { %v1042_v53 = vrot.slane %v1034_v47, %v3812_v62  ;;  %v1049_v56 = vrot.slane %v1035_v48, %v3812_v62  ;;  %v1110_v57 = vrot.slane %v1102_v49, %v3812_v62  ;;  %v4012_v58 = vrot.slane %v1103_v50, %v3812_v62 }
 0x3d9   :  { %v1050_v63 = vcombine.low %v1026_v51, %v1042_v53  ;;  %v1051_v0 = vcombine.high %v1026_v51, %v1042_v53  ;;  %v1052_v1 = vcombine.low %v1033_v52, %v1049_v56  ;;  %v1053_v2 = vcombine.high %v1033_v52, %v1049_v56 }
 0x3da   :  { %v1118_v6 = vcombine.low %v1094_v60, %v1110_v57  ;;  %v1120_v7 = vcombine.low %v4016_v61, %v4012_v58  ;;  %v1119_v9 = vcombine.high %v1094_v60, %v1110_v57  ;;  %v1121_v34 = vcombine.high %v4016_v61, %v4012_v58 }
 0x3db   :  { %3307 = vmatpush3.msra.mxu0 %v1050_v63  ;;  %3312 = vmatpush3.msra.mxu1 %v1051_v0 }
 0x3dc   :  { %3316 = vmatprep.subr.mxu0 %v3618_v41  ;;  %3321 = vmatprep.subr.mxu1 %v3618_v41 }
 0x446   :  { %v1781_v38 = vpop.xlane.xlu1 %1780 }
 0x447   :  { %3440 = vrcp.f32 %v1781_v38 }
 0x44a   :  { %v1787_v10 = vpop.xlane.xlu1 %1786 }
 0x44b   :  { %3442 = vrcp.f32 %v1787_v10  ;;  %v1784_v36 = vpop.xlane.xlu0 %1783 }
 0x44c   :  { %3444 = vrcp.f32 %v1784_v36 }
 0x44f   :  { %v1793_v11 = vpop.xlane.xlu0 %1792 }
 0x450   :  { %3446 = vrcp.f32 %v1793_v11 }
 0x451   :  { %v3441_v32 = vpop.eup %3440 }
 0x452   :  { %v1811_v35 = vmul.f32 %v3441_v32, %v3950_v15  ;;  %v1796_v37 = vpop.xlane.xlu1 %1795 }
 0x453   :  { %v1790_v12 = vpop.xlane.xlu0 %1789 }
 0x454   :  { %3448 = vrcp.f32 %v1790_v12  ;;  %3309 = vmatmul.mubr.msk.f32.vlgmr.msra.gmra.mrb[8].mxu0 %vm1122_vm2, %v1811_v35 }
 0x455   :  { %v3443_v39 = vpop.eup %3442  ;;  %3317 = vmatpush3.msra.mxu0 %v1052_v1  ;;  %3318 = vmatprep.mubr.msk.f32.mxu0 %vm3619_vm1, %v3618_v41  ;;  %3450 = vrcp.f32 %v1796_v37 }
 0x456   :  { %v3445_v13 = vpop.eup %3444  ;;  %v1813_v40 = vmul.f32 %v3443_v39, %v3954_v18  ;;  %3326 = vmatprep.subr.mxu0 %v3618_v41 }
 0x457   :  { %v1812_v14 = vmul.f32 %v3445_v13, %v3956_v20  ;;  %v1799_v4 = vpop.xlane.xlu0 %1798 }
 0x458   :  { %3452 = vrcp.f32 %v1799_v4  ;;  %3319 = vmatmul.mubr.msk.f32.vlgmr.msra.gmra.mrb[10].mxu0 %vm1122_vm2, %v1813_v40 }
 0x459   :  { %3314 = vmatmul.mubr.msk.f32.vlgmr.msra.gmra.mrb[10].mxu1 %vm1122_vm2, %v1812_v14  ;;  %3327 = vmatpush3.msra.mxu0 %v1118_v6 }
 0x45a   :  { %v3447_v15 = vpop.eup %3446  ;;  %3322 = vmatpush3.msra.mxu1 %v1053_v2  ;;  %3328 = vmatprep.mubr.msk.f32.mxu0 %vm3619_vm1, %v3618_v41 }
 0x45b   :  { %v1815_v3 = vmul.f32 %v3447_v15, %v3962_v27  ;;  %v1802_v18 = vpop.xlane.xlu0 %1801  ;;  %3336 = vmatprep.subr.mxu0 %v3618_v41  ;;  %3323 = vmatprep.mubr.msk.f32.mxu1 %vm3619_vm1, %v3618_v41 }
 0x45c   :  { %3454 = vrcp.f32 %v1802_v18  ;;  %3331 = vmatprep.subr.mxu1 %v3618_v41 }
 0x45d   :  { %3329 = vmatmul.mubr.msk.f32.vlgmr.msra.gmra.mrb[12].mxu0 %vm1122_vm2, %v1815_v3 }
 0x45e   :  { %v3449_v20 = vpop.eup %3448  ;;  %3337 = vmatpush3.msra.mxu0 %v1120_v7  ;;  %3338 = vmatprep.mubr.msk.f32.mxu0 %vm3619_vm1, %v3618_v41 }
 0x45f   :  { %v1814_v5 = vmul.f32 %v3449_v20, %v3966_v42  ;;  %v3451_v16 = vpop.eup %3450 }
 0x460   :  { %v1816_v54 = vmul.f32 %v3451_v16, %v3968_v45 }
 0x461   :  { %3324 = vmatmul.mubr.msk.f32.vlgmr.msra.gmra.mrb[12].mxu1 %vm1122_vm2, %v1814_v5 }
 0x462   :  { %v3453_v27 = vpop.eup %3452  ;;  %3332 = vmatpush3.msra.mxu1 %v1119_v9  ;;  %3333 = vmatprep.mubr.msk.f32.mxu1 %vm3619_vm1, %v3618_v41 }
 0x463   :  { %v1817_v55 = vmul.f32 %v3453_v27, %v3970_v23  ;;  %3341 = vmatprep.subr.mxu1 %v3618_v41 }
 0x465   :  { %3334 = vmatmul.mubr.msk.f32.vlgmr.msra.gmra.mrb[14].mxu1 %vm1122_vm2, %v1816_v54  ;;  %3339 = vmatmul.mubr.msk.f32.vlgmr.msra.gmra.mrb[14].mxu0 %vm1122_vm2, %v1817_v55 }
 0x466   :  { %v3455_v17 = vpop.eup %3454  ;;  %3342 = vmatpush3.msra.mxu1 %v1121_v34  ;;  %3343 = vmatprep.mubr.msk.f32.mxu1 %vm3619_vm1, %v3618_v41 }
 0x467   :  { %v1818_v42 = vmul.f32 %v3455_v17, %v3982_v59 }
 0x469   :  { %3344 = vmatmul.mubr.msk.f32.vlgmr.msra.gmra.mrb[16].mxu1 %vm1122_vm2, %v1818_v42 }
 0x527   :  { %v1888_v19 = vpop.f32.mrb[8].mxu0 }
 0x528   :  { %v3310_v21 = vpop.f32.mrb[9].mxu0 }
 0x52b   :  { %v2034_v45 = vpop.f32.mrb[10].mxu0 }
 0x52c   :  { %v1961_v22 = vpop.f32.mrb[10].mxu1  ;;  %v2403_v23 = vcombine.low %v1888_v19, %v2034_v45  ;;  %v2404_v25 = vcombine.high %v1888_v19, %v2034_v45  ;;  %v3320_v26 = vpop.f32.mrb[11].mxu0 }
 0x52d   :  { %v3315_v28 = vpop.f32.mrb[11].mxu1 }
 0x52e   :  { %v2411_v46 = vrot.slane %v2403_v23, %v3743_v8  ;;  %v2418_v59 = vrot.slane %v2404_v25, %v3743_v8  ;;  %v2707_v23 = vld [vmem:[#allocation8] sm:$0xff]  ;;  %v2708_v25 = vld [vmem:[#allocation8 + $0x8] sm:$0xff] }
 0x530   :  { %v2180_v29 = vpop.f32.mrb[12].mxu0 }
 0x531   :  { %v3330_v33 = vpop.f32.mrb[13].mxu0 }
 0x532   :  { %v3383_v33 = vpack.c.bf16 %v2708_v25, %v2707_v23 }
 0x534   :  { %v2107_v43 = vpop.f32.mrb[12].mxu1  ;;  %3384 = vmatprep.subr.bf16.mxu0 %v3383_v33 }
 0x535   :  { %v2419_v44 = vcombine.low %v1961_v22, %v2107_v43  ;;  %v2420_v30 = vcombine.high %v1961_v22, %v2107_v43  ;;  %v3325_v31 = vpop.f32.mrb[13].mxu1  ;;  %3386 = vmatpush3.bf16.msra.mxu0 %v3383_v33 }
 0x537   :  { %v2427_v24 = vrot.slane %v2419_v44, %v3743_v8  ;;  %v2434_v47 = vrot.slane %v2420_v30, %v3743_v8 }
 0x538   :  { %v2253_v48 = vpop.f32.mrb[14].mxu1  ;;  %v2326_v49 = vpop.f32.mrb[14].mxu0 }
 0x539   :  { %v2435_v50 = vcombine.low %v2411_v46, %v2427_v24  ;;  %v2436_v51 = vcombine.high %v2411_v46, %v2427_v24  ;;  %v2451_v52 = vcombine.low %v2418_v59, %v2434_v47  ;;  %v2452_v53 = vcombine.high %v2418_v59, %v2434_v47  ;;  %v3335_v56 = vpop.f32.mrb[15].mxu1  ;;  %v3340_v57 = vpop.f32.mrb[15].mxu0 }
 0x53a   :  { %v2471_v58 = vcombine.low %v2180_v29, %v2326_v49  ;;  %v2472_v60 = vcombine.high %v2180_v29, %v2326_v49 }
 0x53b   :  { %v2459_v61 = vrot.slane %v2451_v52, %v3812_v62  ;;  %v2443_v0 = vrot.slane %v2435_v50, %v3812_v62  ;;  %v2450_v1 = vrot.slane %v2436_v51, %v3812_v62  ;;  %v2466_v2 = vrot.slane %v2452_v53, %v3812_v62 }
 0x53c   :  { %v2399_v63 = vpop.f32.mrb[16].mxu1  ;;  %v2479_v38 = vrot.slane %v2471_v58, %v3743_v8  ;;  %v2486_v10 = vrot.slane %v2472_v60, %v3743_v8 }
 0x53d   :  { %v3345_v6 = vpop.f32.mrb[17].mxu1  ;;  %v2487_v7 = vcombine.low %v2253_v48, %v2399_v63  ;;  %v2488_v9 = vcombine.high %v2253_v48, %v2399_v63  ;;  %v2469_v34 = vcombine.high %v2459_v61, %v3618_v41  ;;  %v2467_v32 = vcombine.high %v2443_v0, %v3618_v41  ;;  %v2709_v63 = vld [vmem:[#allocation8 + $0x10] sm:$0xff] }
 0x53e   :  { %v2468_v35 = vcombine.high %v2450_v1, %v3618_v41  ;;  %v2470_v12 = vcombine.high %v2466_v2, %v3618_v41 }
 0x53f   :  { %v2495_v36 = vrot.slane %v2487_v7, %v3743_v8  ;;  %v2502_v11 = vrot.slane %v2488_v9, %v3743_v8  ;;  %v2607_v14 = vcombine.low %v2459_v61, %v2469_v34  ;;  %v2539_v5 = vcombine.low %v2443_v0, %v2467_v32  ;;  %v2710_v0 = vld [vmem:[#allocation8 + $0x18] sm:$0xff] }
 0x540   :  { %v2623_v20 = vcombine.low %v2466_v2, %v2470_v12  ;;  %v2555_v16 = vcombine.low %v2450_v1, %v2468_v35 }
 0x541   :  { %v2503_v37 = vcombine.low %v2479_v38, %v2495_v36  ;;  %v2504_v39 = vcombine.high %v2479_v38, %v2495_v36  ;;  %v2519_v13 = vcombine.low %v2486_v10, %v2502_v11  ;;  %v2520_v40 = vcombine.high %v2486_v10, %v2502_v11 }
 0x542   :  { %v2614_v42 = vrot.slane %v2607_v14, %v3743_v8  ;;  %v2630_v26 = vrot.slane %v2623_v20, %v3743_v8  ;;  %v2546_v28 = vrot.slane %v2539_v5, %v3743_v8  ;;  %v2562_v29 = vrot.slane %v2555_v16, %v3743_v8  ;;  %v2853_v5 = vld [vmem:[%s4172_s5 + $0x10] sm:$0xff]  ;;  %v2854_v16 = vld [vmem:[%s4172_s5 + $0x18] sm:$0xff] }
 0x543   :  { %v2511_v4 = vrot.slane %v2503_v37, %v3812_v62  ;;  %v2518_v15 = vrot.slane %v2504_v39, %v3812_v62  ;;  %v2527_v3 = vrot.slane %v2519_v13, %v3812_v62  ;;  %v2534_v18 = vrot.slane %v2520_v40, %v3812_v62 }
 0x544   :  { %v3387_v36 = vpack.c.bf16 %v2710_v0, %v2709_v63 }
 0x545   :  { %v2535_v27 = vcombine.high %v2511_v4, %v3618_v41  ;;  %v2536_v54 = vcombine.high %v2518_v15, %v3618_v41  ;;  %v2537_v55 = vcombine.high %v2527_v3, %v3618_v41  ;;  %v2538_v17 = vcombine.high %v2534_v18, %v3618_v41 }
 0x546   :  { %3388 = vmatprep.subr.bf16.mxu0 %v3387_v36 }
 0x547   :  { %v2615_v19 = vcombine.low %v2527_v3, %v2537_v55  ;;  %v2631_v21 = vcombine.low %v2534_v18, %v2538_v17  ;;  %v2547_v45 = vcombine.low %v2511_v4, %v2535_v27  ;;  %v2563_v22 = vcombine.low %v2518_v15, %v2536_v54  ;;  %3390 = vmatpush3.bf16.msra.mxu0 %v3387_v36  ;;  %v2851_v3 = vld [vmem:[%s4172_s5] sm:$0xff]  ;;  %v2852_v18 = vld [vmem:[%s4172_s5 + $0x8] sm:$0xff] }
 0x548   :  { %v3391_v20 = vpack.c.bf16 %v2852_v18, %v2851_v3  ;;  %v3395_v27 = vpack.c.bf16 %v2854_v16, %v2853_v5  ;;  %v3192_v54 = vld [vmem:[#allocation10] ss:$0 sm:$0xff]  ;;  %v3195_v36 = vld [vmem:[%s4173_s6] ss:$0 sm:$0xff]  ;;  %s3624_s6 = smov [#allocation11]  }
 0x549   :  { %v2622_v43 = vrot.slane %v2615_v19, %v3743_v8  ;;  %v2638_v44 = vrot.slane %v2631_v21, %v3743_v8  ;;  %v2554_v41 = vrot.slane %v2547_v45, %v3743_v8  ;;  %v2570_v30 = vrot.slane %v2563_v22, %v3743_v8 }
 0x54a   :  { %3392 = vmatprep.subr.bf16.mxu1 %v3391_v20 }
 0x54b   :  { %v2639_v31 = vcombine.low %v2614_v42, %v2622_v43  ;;  %v2655_v46 = vcombine.low %v2630_v26, %v2638_v44  ;;  %v2571_v59 = vcombine.low %v2546_v28, %v2554_v41  ;;  %v2587_v24 = vcombine.low %v2562_v29, %v2570_v30  ;;  %3394 = vmatpush3.bf16.msra.mxu1 %v3391_v20 }
 0x54c   :  { %v2572_v47 = vcombine.high %v2546_v28, %v2554_v41  ;;  %v2588_v48 = vcombine.high %v2562_v29, %v2570_v30  ;;  %v2640_v49 = vcombine.high %v2614_v42, %v2622_v43  ;;  %v2656_v50 = vcombine.high %v2630_v26, %v2638_v44  ;;  %3396 = vmatprep.subr.bf16.mxu1 %v3395_v27  ;;  %v3456_v43 = vld [vmem:[#allocation2 + $0xa] sm:$0x3]  ;;  %v3457_v30 = vld [vmem:[#allocation2] sm:$0x3] }
 0x54d   :  { %v2647_v51 = vrot.slane %v2639_v31, %v3812_v62  ;;  %v2663_v52 = vrot.slane %v2655_v46, %v3812_v62  ;;  %v2579_v53 = vrot.slane %v2571_v59, %v3812_v62  ;;  %v2595_v56 = vrot.slane %v2587_v24, %v3812_v62  ;;  %v3458_v46 = vld [vmem:[#allocation2 + $0x2] sm:$0x3]  ;;  %v3459_v24 = vld [vmem:[#allocation2 + $0x8] sm:$0x3] }
 0x54e   :  { %v2586_v57 = vrot.slane %v2572_v47, %v3812_v62  ;;  %v2602_v58 = vrot.slane %v2588_v48, %v3812_v62  ;;  %v2654_v60 = vrot.slane %v2640_v49, %v3812_v62  ;;  %v2670_v61 = vrot.slane %v2656_v50, %v3812_v62  ;;  %v3460_v48 = vld [vmem:[#allocation2 + $0xc] sm:$0x3]  ;;  %v3461_v50 = vld [vmem:[#allocation2 + $0xe] sm:$0x3] }
 0x54f   :  { %v2672_v1 = vcombine.high %v2647_v51, %v2663_v52  ;;  %v2671_v2 = vcombine.low %v2647_v51, %v2663_v52  ;;  %v2604_v6 = vcombine.high %v2579_v53, %v2595_v56  ;;  %v2603_v7 = vcombine.low %v2579_v53, %v2595_v56  ;;  %3398 = vmatpush3.bf16.msra.mxu1 %v3395_v27  ;;  %v3462_v52 = vld [vmem:[#allocation2 + $0x4] sm:$0x3]  ;;  %v3463_v56 = vld [vmem:[#allocation2 + $0x6] sm:$0x3] }
 0x550   :  { %v2606_v9 = vcombine.high %v2586_v57, %v2602_v58  ;;  %v2605_v34 = vcombine.low %v2586_v57, %v2602_v58  ;;  %v2673_v38 = vcombine.low %v2654_v60, %v2670_v61  ;;  %v2674_v10 = vcombine.high %v2654_v60, %v2670_v61 }
 0x551   :  { %2679 = vrot.lane.b32.xlu0 %v2672_v1, %s3606_s20  ;;  %2677 = vrot.lane.b32.xlu1 %v2604_v6, %s3606_s20 }
 0x555   :  { %2693 = vrot.lane.b32.xlu0 %v2606_v9, %s3622_s14  ;;  %2685 = vrot.lane.b32.xlu1 %v2605_v34, %s3623_s15  ;;  %v2983_v34 = vld [vmem:[%s4174_s7] sm:$0xff] }
 0x559   :  { %2687 = vrot.lane.b32.xlu1 %v2673_v38, %s3623_s15  ;;  %v2984_v38 = vld [vmem:[%s4174_s7 + $0x8] sm:$0xff]  ;;  %s3139_s7 = sshll.u32 %s3624_s6, 4  ;;  %s3140_s7 = int_to_ptr.vmem [resolvable:$true] %s3139_s7 }
 0x55a   :  { %p3579_p13 = scmp.lt.s32.totalorder %s3140_s7, %s3140_s7 }
 0x55d   :  { %2695 = vrot.lane.b32.xlu1 %v2674_v10, %s3622_s14  ;;  %v3399_v10 = vpack.c.bf16 %v2984_v38, %v2983_v34 }
 0x55f   :  { %3400 = vmatprep.subr.bf16.mxu0 %v3399_v10 }
 0x5c3   :  { %v2680_v62 = vpop.permute.xlu0 %2679  ;;  %v2678_v11 = vpop.permute.xlu1 %2677 }
 0x5c4   :  { %v2699_v32 = vsel %vm1122_vm2, %v2603_v7, %v2678_v11  ;;  %v2700_v40 = vsel %vm1122_vm2, %v2671_v2, %v2680_v62 }
 0x5c7   :  { %v2694_v35 = vpop.permute.xlu0 %2693  ;;  %v2686_v12 = vpop.permute.xlu1 %2685 }
 0x5c8   :  { %v2702_v37 = vsel %vm2701_vm3, %v2699_v32, %v2686_v12  ;;  %v3198_v12 = vld [vmem:[%s4175_s8] ss:$0 sm:$0xff]  ;;  %s3574_s8 = scalar_lea.vmem %s3140_s7, 256 }
 0x5c9   :  { %v2705_v39 = vsel %vm2704_vm4, %v2702_v37, %v2694_v35  ;;  %p3575_p12 = scmp.ne.s32.totalorder %s3140_s7, %s3574_s8  ;;  %p3580_p0 = scmp.lt.s32.totalorder %s3574_s8, %s3574_s8 }
 0x5ca   :  { %3354 = vmatprep.mubr.msk.f32.mxu0 %vm158_vm0, %v2705_v39 }
 0x5cb   :  { %v2688_v13 = vpop.permute.xlu1 %2687  ;;  %p3581_p1 = por %p3580_p0, %p3579_p13 }
 0x5cc   :  { %v2703_v14 = vsel %vm2701_vm3, %v2700_v40, %v2688_v13 }
 0x5cd   :  { %p3582_p2 = pnand %p3581_p1, %p3575_p12 }
 0x5cf   :  { %v2696_v4 = vpop.permute.xlu1 %2695 }
 0x5d0   :  { %v2706_v15 = vsel %vm2704_vm4, %v2703_v14, %v2696_v4 }
 0x5d1   :  { %3355 = vmatmul.mubr.msk.f32.vlgmr.msra.gmra.mrb[16].mxu0 %vm158_vm0, %v2706_v15 }
 0x5d2   :  { %3402 = vmatpush3.bf16.msra.mxu0 %v3399_v10 }
 0x6a4   :  { %v3356_v55 = vpop.f32.mrb[16].mxu0 }
 0x6a5   :  { %v2796_v17 = vadd.f32 %v3356_v55, %v3192_v54  ;;  %v2790_v42 = vpop.f32.mrb[17].mxu0 }
 0x6a6   :  { %v2791_v19 = vadd.f32 %v3192_v54, %v2790_v42 }
 0x6a7   :  { %v2818_v21 = vcombine.high %v2796_v17, %v2796_v17  ;;  %v2825_v45 = vrot.slane %v2796_v17, %v3743_v8 }
 0x6a8   :  { %v2801_v22 = vcombine.high %v2791_v19, %v2791_v19  ;;  %v2808_v23 = vrot.slane %v2791_v19, %v3743_v8 }
 0x6a9   :  { %v2832_v25 = vrot.slane %v2818_v21, %v3743_v8  ;;  %v2833_v26 = vcombine.high %v2825_v45, %v2825_v45  ;;  %v2847_v47 = vadd.f32 %v3459_v24, %v2825_v45 }
 0x6aa   :  { %v2815_v28 = vrot.slane %v2801_v22, %v3743_v8  ;;  %v2816_v29 = vcombine.high %v2808_v23, %v2808_v23  ;;  %v2843_v31 = vadd.f32 %v3457_v30, %v2808_v23 }
 0x6ab   :  { %v2834_v33 = vcombine.high %v2832_v25, %v2832_v25  ;;  %v2848_v44 = vadd.f32 %v3456_v43, %v2833_v26  ;;  %v2849_v49 = vadd.f32 %v3460_v48, %v2832_v25 }
 0x6ac   :  { %v2817_v41 = vcombine.high %v2815_v28, %v2815_v28  ;;  %v2844_v59 = vadd.f32 %v3458_v46, %v2816_v29  ;;  %v2845_v53 = vadd.f32 %v3462_v52, %v2815_v28 }
 0x6ad   :  { %v2850_v51 = vadd.f32 %v3461_v50, %v2834_v33  ;;  %v2887_v60 = vcombine.low %v2847_v47, %v2848_v44 }
 0x6ae   :  { %v2846_v57 = vadd.f32 %v3463_v56, %v2817_v41  ;;  %v2870_v58 = vcombine.low %v2843_v31, %v2844_v59 }
 0x6af   :  { %v2888_v61 = vcombine.low %v2849_v49, %v2850_v51  ;;  %v2895_v6 = vrot.slane %v2887_v60, %v3743_v8 }
 0x6b0   :  { %v2871_v63 = vcombine.low %v2845_v53, %v2846_v57  ;;  %v2878_v1 = vrot.slane %v2870_v58, %v3743_v8 }
 0x6b1   :  { %v2902_v0 = vrot.slane %v2888_v61, %v3743_v8 }
 0x6b2   :  { %v2885_v2 = vrot.slane %v2871_v63, %v3743_v8 }
 0x6b3   :  { %v2903_v9 = vcombine.low %v2895_v6, %v2902_v0 }
 0x6b4   :  { %v2886_v7 = vcombine.low %v2878_v1, %v2885_v2 }
 0x6b6   :  { %3365 = vmatprep.mubr.msk.f32.mxu1 %vm158_vm0, %v2886_v7 }
 0x6b7   :  { %3366 = vmatmul.mubr.msk.f32.vlgmr.msra.gmra.mrb[18].mxu1 %vm158_vm0, %v2903_v9 }
 0x78a   :  { %v3367_v62 = vpop.f32.mrb[18].mxu1 }
 0x78b   :  { %v2974_v11 = vpop.f32.mrb[19].mxu1  ;;  %v2980_v35 = vadd.f32 %v3367_v62, %v3195_v36 }
 0x78c   :  { %v2975_v32 = vadd.f32 %v3195_v36, %v2974_v11 }
 0x78e   :  { %3372 = vmatprep.mubr.msk.f32.mxu0 %vm2701_vm3, %v2975_v32 }
 0x78f   :  { %3373 = vmatmul.mubr.msk.f32.vlgmr.msra.gmra.mrb[18].mxu0 %vm2701_vm3, %v2980_v35 }
 0x862   :  { %v3374_v37 = vpop.f32.mrb[18].mxu0 }
 0x863   :  { %v3070_v39 = vadd.f32 %v3374_v37, %v3198_v12  ;;  %v3064_v13 = vpop.f32.mrb[19].mxu0 }
 0x864   :  { %v3065_v40 = vadd.f32 %v3198_v12, %v3064_v13 }
 0x865   :  { %v3092_v14 = vcombine.high %v3070_v39, %v3070_v39  ;;  %v3099_v4 = vrot.slane %v3070_v39, %v3743_v8 }
 0x866   :  { %v3075_v15 = vcombine.high %v3065_v40, %v3065_v40  ;;  %v3082_v3 = vrot.slane %v3065_v40, %v3743_v8 }
 0x867   :  { %v3106_v18 = vrot.slane %v3092_v14, %v3743_v8  ;;  %v3107_v20 = vcombine.high %v3099_v4, %v3099_v4  ;;  %v3121_v5 = vadd.f32 %v3099_v4, %v2847_v47 }
 0x868   :  { %v3089_v16 = vrot.slane %v3075_v15, %v3743_v8  ;;  %v3090_v27 = vcombine.high %v3082_v3, %v3082_v3  ;;  %v3117_v54 = vadd.f32 %v3082_v3, %v2843_v31 }
 0x869   :  { %v3108_v55 = vcombine.high %v3106_v18, %v3106_v18  ;;  %v3122_v17 = vadd.f32 %v3107_v20, %v2848_v44  ;;  %v3123_v42 = vadd.f32 %v3106_v18, %v2849_v49  ;;  %3130 = vst.msk [vmem:[#allocation11 + $0x8] sm:$0x3] %vm3125_vm5, %v3121_v5 }
 0x86a   :  { %v3091_v19 = vcombine.high %v3089_v16, %v3089_v16  ;;  %v3118_v21 = vadd.f32 %v3090_v27, %v2844_v59  ;;  %v3119_v45 = vadd.f32 %v3089_v16, %v2845_v53  ;;  %3126 = vst.msk [vmem:[#allocation11] sm:$0x3] %vm3125_vm5, %v3117_v54 }
 0x86b   :  { %v3124_v22 = vadd.f32 %v3108_v55, %v2850_v51  ;;  %3131 = vst.msk [vmem:[#allocation11 + $0xa] sm:$0x3] %vm3125_vm5, %v3122_v17  ;;  %3132 = vst.msk [vmem:[#allocation11 + $0xc] sm:$0x3] %vm3125_vm5, %v3123_v42 }
 0x86c   :  { %v3120_v8 = vadd.f32 %v3091_v19, %v2846_v57  ;;  %3127 = vst.msk [vmem:[#allocation11 + $0x2] sm:$0x3] %vm3125_vm5, %v3118_v21  ;;  %3128 = vst.msk [vmem:[#allocation11 + $0x4] sm:$0x3] %vm3125_vm5, %v3119_v45 }
 0x86d   :  { %3133 = vst.msk [vmem:[#allocation11 + $0xe] sm:$0x3] %vm3125_vm5, %v3124_v22 }
 0x86e   :  { %3129 = vst.msk [vmem:[#allocation11 + $0x6] sm:$0x3] %vm3125_vm5, %v3120_v8 }
 0x86f   :  { %3585 = shalt.err (!%p3582_p2)
}
 0x870   :  { %s3586_s4 = scalar_lea.hbm %s4176_s9, 256 }
 0x871   :  { %p3587_p3 = scmp.ne.s32.totalorder %s4176_s9, %s3586_s4  ;;  %p3590_p4 = scmp.lt.u32.totalorder %s3586_s4, %s4176_s9 }
 0x873   :  { %p3592_p5 = pnand %p3590_p4, %p3587_p3 }
 0x875   :  { %3595 = shalt.err (!%p3592_p5)
}
 0x876   :  { %3145 = dma.vmem_to_hbm [thread:$0]  %s3140_s7, 256, %s4176_s9, [#allocation4], %s3609_s3, %s3609_s3, %s3610_s19  }
 0x877   :  { %3602 = dma.done.wait [#allocation4], 256  }
 0x878   :  { %3603 = vsyncadd [#allocation4], 4294967040 }
 0x879   :  { %3149 = vsyncpa [#allocation3], 1 }
 0x87a   :  { %3150 = vsyncpa [#allocation6], 1 }
 0x87b   :  { %3151 = vsyncpa [#allocation9], 1 }
 0x87c   :  { %3152 = vsyncpa [#allocation4], 1 }

</bundles_post_ra>
